<compile_context>
chip_gen: v7x
topology: tpu7x:2x2x1
jax: 0.10.0
libtpu: 0.0.40
codegen_flags: <defaults>
</compile_context>

<pallas_src>
import functools

import jax
import jax.numpy as jnp
from jax.experimental import pallas as pl
from jax.experimental.pallas import tpu as pltpu


def _round_up(x, m):
    return (x + m - 1) // m * m


def _inner_production_kernel(x_ref, out_ref, xt_ref, pairs_ref, *,
                             field_num, k, num_pairs, np_pad):
    # x_ref:     [TB, F*k]       input tile  (batch on sublanes, features on lanes)
    # xt_ref:    [F*k, TB] f32   transposed tile (k on sublanes, batch on lanes)
    # pairs_ref: [np_pad, TB] f32 one lane-dense row per (i, j) pair
    # out_ref:   [TB, num_pairs] final orientation, written once per tile

    if np_pad != num_pairs:
        # Keep the padding rows deterministic so the final transpose never
        # touches uninitialized scratch (values are sliced off before store).
        pairs_ref[num_pairs:, :] = jnp.zeros(
            (np_pad - num_pairs,) + pairs_ref.shape[1:], dtype=pairs_ref.dtype)

    # One whole-tile transpose + single f32 cast (XLU work, hidden under the
    # auto double-buffered HBM DMA pipeline).
    xt_ref[...] = x_ref[...].astype(jnp.float32).T

    p = 0
    for i in range(field_num - 1):
        xi = xt_ref[i * k:(i + 1) * k, :]            # [k, TB], loaded once per i
        for j in range(i + 1, field_num):
            xj = xt_ref[j * k:(j + 1) * k, :]        # [k, TB]
            # Full-lane-width multiply; reduce over sublanes (k) -> [TB],
            # already lane-dense for the row store into the pair scratch.
            pairs_ref[p, :] = jnp.sum(xi * xj, axis=0)
            p += 1

    # Single in-kernel transpose back to the module's [batch, num_pairs]
    # orientation -> the wrapper needs no extra HBM transpose pass.
    out_ref[...] = pairs_ref[...].T[:, :num_pairs].astype(out_ref.dtype)
    # TODO(synk): for F >~ 12, replace the unrolled pair loop with a
    # lax.fori_loop over an SMEM (i, j) pair table to bound code size.


def inner_production(x, *, block_batch=1024,
                     vmem_budget_bytes=12 * 1024 * 1024):
    """Pallas implementation of InnerProduction.forward.

    x: [batch, field, k]  ->  [batch, field*(field-1)//2]
    """
    batch, field_num, k = x.shape
    num_pairs = field_num * (field_num - 1) // 2
    if num_pairs == 0:
        return jnp.zeros((batch, 0), dtype=x.dtype)
    fk = field_num * k
    np_pad = _round_up(num_pairs, 8)

    # Lane-dense input slab (free, row-major reshape).
    x2 = x.reshape(batch, fk)

    in_bytes = jnp.dtype(x.dtype).itemsize
    out_bytes = in_bytes
    # Per-batch-row VMEM bytes: double-buffered input + output blocks plus the
    # single-buffered f32 scratch (transposed tile + pair rows).
    per_row = 2 * fk * in_bytes + 2 * num_pairs * out_bytes + 4 * fk + 4 * np_pad
    tb = max(8, min(block_batch, (vmem_budget_bytes // per_row) // 8 * 8))
    # Megacore (v7x): if the whole batch would fit in one tile, split it so
    # there are >= 2 grid steps and both TensorCores get work.
    if batch >= 256 and batch <= tb:
        tb = _round_up((batch + 1) // 2, 8)
    tb = max(8, min(tb, _round_up(batch, 8)))

    grid = (pl.cdiv(batch, tb),)   # ragged last tile handled by Pallas masking

    kernel = functools.partial(
        _inner_production_kernel,
        field_num=field_num, k=k, num_pairs=num_pairs, np_pad=np_pad)

    cost = pl.CostEstimate(
        flops=2 * batch * num_pairs * k,
        transcendentals=0,
        bytes_accessed=batch * fk * in_bytes + batch * num_pairs * out_bytes,
    )

    return pl.pallas_call(
        kernel,
        out_shape=jax.ShapeDtypeStruct((batch, num_pairs), x.dtype),
        grid=grid,
        in_specs=[pl.BlockSpec((tb, fk), lambda i: (i, 0))],
        out_specs=pl.BlockSpec((tb, num_pairs), lambda i: (i, 0)),
        scratch_shapes=[
            pltpu.VMEM((fk, tb), jnp.float32),      # transposed f32 tile
            pltpu.VMEM((np_pad, tb), jnp.float32),  # pair rows (lane-dense)
        ],
        compiler_params=pltpu.CompilerParams(
            dimension_semantics=("parallel",),
            vmem_limit_bytes=32 * 1024 * 1024,
        ),
        cost_estimate=cost,
    )(x2)


def inner_production_ref(x):
    """Pure-JAX reference mirroring the PyTorch loop."""
    field_num = x.shape[1]
    row, col = [], []
    for i in range(field_num - 1):
        for j in range(i + 1, field_num):
            row.append(i)
            col.append(j)
    q = jnp.stack([x[:, idx, :] for idx in row], axis=1)
    p = jnp.stack([x[:, idx, :] for idx in col], axis=1)
    return jnp.sum(q * p, axis=-1)


if __name__ == "__main__":
    key = jax.random.PRNGKey(0)
    batch, field, k = 8, 4, 32  # small shapes: embedded input [batch, field, k]
    x = jax.random.normal(key, (batch, field, k), dtype=jnp.float32)

    out = jax.block_until_ready(inner_production(x))
    ref = inner_production_ref(x)
    assert out.shape == (batch, field * (field - 1) // 2), out.shape
    assert jnp.allclose(out, ref, atol=1e-5, rtol=1e-5), "mismatch vs reference"

    # Multi-tile path with a ragged last tile (batch not a multiple of the
    # tile) and a different field/k combination.
    batch2, field2, k2 = 300, 5, 16
    x_big = jax.random.normal(
        jax.random.PRNGKey(1), (batch2, field2, k2), dtype=jnp.float32)
    out_big = jax.block_until_ready(inner_production(x_big))
    ref_big = inner_production_ref(x_big)
    assert out_big.shape == ref_big.shape, out_big.shape
    assert jnp.allclose(out_big, ref_big, atol=1e-5, rtol=1e-5), (
        "mismatch vs reference (tiled / ragged path)")

    print("KERNEL_OK")
</pallas_src>

<mosaic_0001>
module attributes {stable_mosaic.version = 11 : i64} {
  func.func @_inner_production_kernel(%arg0: i32, %arg1: memref<8x128xf32, #tpu.memory_space<vmem>>, %arg2: memref<8x6xf32, #tpu.memory_space<vmem>>, %arg3: memref<128x8xf32, #tpu.memory_space<vmem>>, %arg4: memref<8x8xf32, #tpu.memory_space<vmem>>) attributes {dimension_semantics = [#tpu.dimension_semantics<parallel>], iteration_bounds = array<i64: 1>, scalar_prefetch = 0 : i64, scratch_operands = 2 : i64, tpu.core_type = #tpu.core_type<tc>, window_params = [{transform_indices = @transform_0, window_bounds = array<i64: 8, 128>}, {transform_indices = @transform_1, window_bounds = array<i64: 8, 6>}]} {
    %cst = arith.constant 0.000000e+00 : f32
    %0 = vector.broadcast %cst : f32 to vector<2x8xf32>
    %c6 = arith.constant 6 : index
    %c0 = arith.constant 0 : index
    %1 = vector.load %arg4[%c6, %c0] : memref<8x8xf32, #tpu.memory_space<vmem>>, vector<2x8xf32>
    tpu.vector_store %arg4[%c6, %c0], %0 {strides = array<i32>} : memref<8x8xf32, #tpu.memory_space<vmem>>, vector<2x8xf32>,
    %c0_0 = arith.constant 0 : index
    %c0_1 = arith.constant 0 : index
    %2 = vector.load %arg1[%c0_0, %c0_1] : memref<8x128xf32, #tpu.memory_space<vmem>>, vector<8x128xf32>
    %3 = tpu.transpose %2, [1, 0] : vector<8x128xf32> -> vector<128x8xf32>
    %c0_2 = arith.constant 0 : index
    %c0_3 = arith.constant 0 : index
    %4 = vector.load %arg3[%c0_2, %c0_3] : memref<128x8xf32, #tpu.memory_space<vmem>>, vector<128x8xf32>
    tpu.vector_store %arg3[%c0_2, %c0_3], %3 {strides = array<i32>} : memref<128x8xf32, #tpu.memory_space<vmem>>, vector<128x8xf32>,
    %c0_4 = arith.constant 0 : index
    %c0_5 = arith.constant 0 : index
    %5 = vector.load %arg3[%c0_4, %c0_5] : memref<128x8xf32, #tpu.memory_space<vmem>>, vector<32x8xf32>
    %c32 = arith.constant 32 : index
    %c0_6 = arith.constant 0 : index
    %6 = vector.load %arg3[%c32, %c0_6] : memref<128x8xf32, #tpu.memory_space<vmem>>, vector<32x8xf32>
    %7 = arith.mulf %5, %6 : vector<32x8xf32>
    %cst_7 = arith.constant dense<0.000000e+00> : vector<8xf32>
    %8 = vector.multi_reduction <add>, %7, %cst_7 [0] : vector<32x8xf32> to vector<8xf32>
    %c0_8 = arith.constant 0 : index
    %c0_9 = arith.constant 0 : index
    %9 = vector.load %arg4[%c0_8, %c0_9] : memref<8x8xf32, #tpu.memory_space<vmem>>, vector<1x8xf32>
    %10 = vector.shape_cast %9 : vector<1x8xf32> to vector<8xf32>
    %11 = vector.shape_cast %8 : vector<8xf32> to vector<1x8xf32>
    tpu.vector_store %arg4[%c0_8, %c0_9], %11 {strides = array<i32>} : memref<8x8xf32, #tpu.memory_space<vmem>>, vector<1x8xf32>,
    %c64 = arith.constant 64 : index
    %c0_10 = arith.constant 0 : index
    %12 = vector.load %arg3[%c64, %c0_10] : memref<128x8xf32, #tpu.memory_space<vmem>>, vector<32x8xf32>
    %13 = arith.mulf %5, %12 : vector<32x8xf32>
    %cst_11 = arith.constant dense<0.000000e+00> : vector<8xf32>
    %14 = vector.multi_reduction <add>, %13, %cst_11 [0] : vector<32x8xf32> to vector<8xf32>
    %c1 = arith.constant 1 : index
    %c0_12 = arith.constant 0 : index
    %15 = vector.load %arg4[%c1, %c0_12] : memref<8x8xf32, #tpu.memory_space<vmem>>, vector<1x8xf32>
    %16 = vector.shape_cast %15 : vector<1x8xf32> to vector<8xf32>
    %17 = vector.shape_cast %14 : vector<8xf32> to vector<1x8xf32>
    tpu.vector_store %arg4[%c1, %c0_12], %17 {strides = array<i32>} : memref<8x8xf32, #tpu.memory_space<vmem>>, vector<1x8xf32>,
    %c96 = arith.constant 96 : index
    %c0_13 = arith.constant 0 : index
    %18 = vector.load %arg3[%c96, %c0_13] : memref<128x8xf32, #tpu.memory_space<vmem>>, vector<32x8xf32>
    %19 = arith.mulf %5, %18 : vector<32x8xf32>
    %cst_14 = arith.constant dense<0.000000e+00> : vector<8xf32>
    %20 = vector.multi_reduction <add>, %19, %cst_14 [0] : vector<32x8xf32> to vector<8xf32>
    %c2 = arith.constant 2 : index
    %c0_15 = arith.constant 0 : index
    %21 = vector.load %arg4[%c2, %c0_15] : memref<8x8xf32, #tpu.memory_space<vmem>>, vector<1x8xf32>
    %22 = vector.shape_cast %21 : vector<1x8xf32> to vector<8xf32>
    %23 = vector.shape_cast %20 : vector<8xf32> to vector<1x8xf32>
    tpu.vector_store %arg4[%c2, %c0_15], %23 {strides = array<i32>} : memref<8x8xf32, #tpu.memory_space<vmem>>, vector<1x8xf32>,
    %c32_16 = arith.constant 32 : index
    %c0_17 = arith.constant 0 : index
    %24 = vector.load %arg3[%c32_16, %c0_17] : memref<128x8xf32, #tpu.memory_space<vmem>>, vector<32x8xf32>
    %c64_18 = arith.constant 64 : index
    %c0_19 = arith.constant 0 : index
    %25 = vector.load %arg3[%c64_18, %c0_19] : memref<128x8xf32, #tpu.memory_space<vmem>>, vector<32x8xf32>
    %26 = arith.mulf %24, %25 : vector<32x8xf32>
    %cst_20 = arith.constant dense<0.000000e+00> : vector<8xf32>
    %27 = vector.multi_reduction <add>, %26, %cst_20 [0] : vector<32x8xf32> to vector<8xf32>
    %c3 = arith.constant 3 : index
    %c0_21 = arith.constant 0 : index
    %28 = vector.load %arg4[%c3, %c0_21] : memref<8x8xf32, #tpu.memory_space<vmem>>, vector<1x8xf32>
    %29 = vector.shape_cast %28 : vector<1x8xf32> to vector<8xf32>
    %30 = vector.shape_cast %27 : vector<8xf32> to vector<1x8xf32>
    tpu.vector_store %arg4[%c3, %c0_21], %30 {strides = array<i32>} : memref<8x8xf32, #tpu.memory_space<vmem>>, vector<1x8xf32>,
    %c96_22 = arith.constant 96 : index
    %c0_23 = arith.constant 0 : index
    %31 = vector.load %arg3[%c96_22, %c0_23] : memref<128x8xf32, #tpu.memory_space<vmem>>, vector<32x8xf32>
    %32 = arith.mulf %24, %31 : vector<32x8xf32>
    %cst_24 = arith.constant dense<0.000000e+00> : vector<8xf32>
    %33 = vector.multi_reduction <add>, %32, %cst_24 [0] : vector<32x8xf32> to vector<8xf32>
    %c4 = arith.constant 4 : index
    %c0_25 = arith.constant 0 : index
    %34 = vector.load %arg4[%c4, %c0_25] : memref<8x8xf32, #tpu.memory_space<vmem>>, vector<1x8xf32>
    %35 = vector.shape_cast %34 : vector<1x8xf32> to vector<8xf32>
    %36 = vector.shape_cast %33 : vector<8xf32> to vector<1x8xf32>
    tpu.vector_store %arg4[%c4, %c0_25], %36 {strides = array<i32>} : memref<8x8xf32, #tpu.memory_space<vmem>>, vector<1x8xf32>,
    %c64_26 = arith.constant 64 : index
    %c0_27 = arith.constant 0 : index
    %37 = vector.load %arg3[%c64_26, %c0_27] : memref<128x8xf32, #tpu.memory_space<vmem>>, vector<32x8xf32>
    %c96_28 = arith.constant 96 : index
    %c0_29 = arith.constant 0 : index
    %38 = vector.load %arg3[%c96_28, %c0_29] : memref<128x8xf32, #tpu.memory_space<vmem>>, vector<32x8xf32>
    %39 = arith.mulf %37, %38 : vector<32x8xf32>
    %cst_30 = arith.constant dense<0.000000e+00> : vector<8xf32>
    %40 = vector.multi_reduction <add>, %39, %cst_30 [0] : vector<32x8xf32> to vector<8xf32>
    %c5 = arith.constant 5 : index
    %c0_31 = arith.constant 0 : index
    %41 = vector.load %arg4[%c5, %c0_31] : memref<8x8xf32, #tpu.memory_space<vmem>>, vector<1x8xf32>
    %42 = vector.shape_cast %41 : vector<1x8xf32> to vector<8xf32>
    %43 = vector.shape_cast %40 : vector<8xf32> to vector<1x8xf32>
    tpu.vector_store %arg4[%c5, %c0_31], %43 {strides = array<i32>} : memref<8x8xf32, #tpu.memory_space<vmem>>, vector<1x8xf32>,
    %c0_32 = arith.constant 0 : index
    %c0_33 = arith.constant 0 : index
    %44 = vector.load %arg4[%c0_32, %c0_33] : memref<8x8xf32, #tpu.memory_space<vmem>>, vector<8x8xf32>
    %45 = tpu.transpose %44, [1, 0] : vector<8x8xf32> -> vector<8x8xf32>
    %46 = vector.extract_strided_slice %45 {offsets = [0, 0], sizes = [8, 6], strides = [1, 1]} : vector<8x8xf32> to vector<8x6xf32>
    %c0_34 = arith.constant 0 : index
    %c0_35 = arith.constant 0 : index
    %47 = vector.load %arg2[%c0_34, %c0_35] : memref<8x6xf32, #tpu.memory_space<vmem>>, vector<8x6xf32>
    tpu.vector_store %arg2[%c0_34, %c0_35], %46 {strides = array<i32>} : memref<8x6xf32, #tpu.memory_space<vmem>>, vector<8x6xf32>,
    return
  }
  func.func @transform_0(%arg0: i32) -> (i32, i32) {
    %c0_i32 = arith.constant 0 : i32
    %c0_i32_0 = arith.constant 0 : i32
    return %arg0, %c0_i32 : i32, i32
  }
  func.func @transform_1(%arg0: i32) -> (i32, i32) {
    %c0_i32 = arith.constant 0 : i32
    %c0_i32_0 = arith.constant 0 : i32
    return %arg0, %c0_i32 : i32, i32
  }
}

</mosaic_0001>

<bundles_post_ra>
// kernel: tpu_custom_call.1
= control target key start
LH: loop header
LB: loop body
LE: loop exit
PB: predicated region body
PF: predicated region fallthrough
CT: control target
= control target key end

     0   :  { %6 = vsyncpa [#allocation5], 0  ;;  %s442_s0 = inlined_call_operand.hbm [shape: f32[8,128], index: 0, kind: input, shape index: {}]   ;;  %s443_s1 = inlined_call_operand.hbm [shape: f32[8,6], index: 1, kind: output, shape index: {}]  }
   0x1   :  { %7 = vsyncpa [#allocation6], 0  ;;  %s319_s6 = smov [#allocation4]   ;;  %s271_s10 = scalar_lea.hbm %s442_s0, 128 }
   0x2   :  { %s14_s7 = sshll.u32 %s319_s6, 4  ;;  %p272_p0 = scmp.ne.s32.totalorder %s442_s0, %s271_s10  ;;  %s15_s7 = int_to_ptr.vmem [resolvable:$true] %s14_s7 }
   0x3   :  { %p275_p1 = scmp.lt.u32.totalorder %s271_s10, %s442_s0 }
   0x5   :  { %p277_p2 = pnand %p275_p1, %p272_p0 }
   0x7   :  { %280 = shalt.err (!%p277_p2)
}
   0x8   :  { %s281_s15 = scalar_lea.vmem %s15_s7, 128  ;;  %p286_p4 = scmp.lt.s32.totalorder %s15_s7, %s15_s7 }
   0x9   :  { %p282_p3 = scmp.ne.s32.totalorder %s15_s7, %s281_s15  ;;  %p287_p5 = scmp.lt.s32.totalorder %s281_s15, %s281_s15 }
   0xb   :  { %p288_p6 = por %p287_p5, %p286_p4 }
   0xd   :  { %p289_p7 = pnand %p288_p6, %p282_p3 }
   0xf   :  { %292 = shalt.err (!%p289_p7)
}
  0x10   :  { %17 = dma.hbm_to_vmem [thread:$0]  %s442_s0, 128, %s15_s7, [#allocation5]  }
  0x11   :  { %315 = dma.done.wait [#allocation5], 128  }
  0x12   :  { %316 = vsyncadd [#allocation5], 4294967168  ;;  %v23_v0 = vld [vmem:[#allocation4] sm:$0xff]  ;;  %vm21_vm0 = vcmask 58368   ;;  %v320_v1 = vmov 0.0   ;;  %vm56_vm1 = vcmask 64512  }
  0x13   :  { %24 = vxpose.xlu0.b32.start.end [1/1] (short) %v23_v0, 128  ;;  %22 = vst.msk [vmem:[#allocation3 + $0x6] sm:$0x3] %vm21_vm0, %v320_v1  ;;  %vm98_vm2 = vcmask 57344   ;;  %s321_s0 = smov [#allocation7]   ;;  %vm251_vm3 = vcmask 48128  }
  0x14   :  { %s259_s18 = sshll.u32 %s321_s0, 4  ;;  %s260_s18 = int_to_ptr.vmem [resolvable:$true] %s259_s18 }
  0x15   :  { %s293_s19 = scalar_lea.vmem %s260_s18, 128  ;;  %p298_p9 = scmp.lt.s32.totalorder %s260_s18, %s260_s18 }
  0x16   :  { %p294_p8 = scmp.ne.s32.totalorder %s260_s18, %s293_s19  ;;  %p299_p10 = scmp.lt.s32.totalorder %s293_s19, %s293_s19 }
  0x18   :  { %p300_p11 = por %p299_p10, %p298_p9 }
  0x1a   :  { %p301_p12 = pnand %p300_p11, %p294_p8 }
  0x93   :  { %v40_v2 = vpop.trf.xlu0 }
  0x94   :  { %57 = vst.msk [vmem:[#allocation2] sm:$0xff] %vm56_vm1, %v40_v2 }
  0x97   :  { %v41_v3 = vpop.trf.xlu0 }
  0x98   :  { %58 = vst.msk [vmem:[#allocation2 + $0x8] sm:$0xff] %vm56_vm1, %v41_v3 }
  0x9b   :  { %v42_v4 = vpop.trf.xlu0  ;;  %v360_v14 = vld [vmem:[#allocation2] sm:$0xff] }
  0x9c   :  { %59 = vst.msk [vmem:[#allocation2 + $0x10] sm:$0xff] %vm56_vm1, %v42_v4 }
  0x9f   :  { %v43_v5 = vpop.trf.xlu0  ;;  %v351_v9 = vld [vmem:[#allocation2 + $0x8] sm:$0xff] }
  0xa0   :  { %60 = vst.msk [vmem:[#allocation2 + $0x18] sm:$0xff] %vm56_vm1, %v43_v5 }
  0xa3   :  { %v44_v6 = vpop.trf.xlu0  ;;  %v364_v16 = vld [vmem:[#allocation2 + $0x10] sm:$0xff] }
  0xa4   :  { %61 = vst.msk [vmem:[#allocation2 + $0x20] sm:$0xff] %vm56_vm1, %v44_v6 }
  0xa7   :  { %v45_v7 = vpop.trf.xlu0  ;;  %v374_v23 = vld [vmem:[#allocation2 + $0x18] sm:$0xff] }
  0xa8   :  { %62 = vst.msk [vmem:[#allocation2 + $0x28] sm:$0xff] %vm56_vm1, %v45_v7 }
  0xab   :  { %v46_v8 = vpop.trf.xlu0  ;;  %v353_v10 = vld [vmem:[#allocation2 + $0x20] sm:$0xff] }
  0xac   :  { %63 = vst.msk [vmem:[#allocation2 + $0x30] sm:$0xff] %vm56_vm1, %v46_v8  ;;  %v81_v15 = vmul.f32 %v353_v10, %v360_v14 }
  0xae   :  { %v85_v21 = vsel %vm56_vm1, %v81_v15, 0.0 }
  0xaf   :  { %v355_v11 = vld [vmem:[#allocation2 + $0x28] sm:$0xff]  ;;  %v47_v12 = vpop.trf.xlu0 }
  0xb0   :  { %v82_v13 = vmul.f32 %v355_v11, %v351_v9  ;;  %64 = vst.msk [vmem:[#allocation2 + $0x38] sm:$0xff] %vm56_vm1, %v47_v12 }
  0xb2   :  { %v86_v19 = vsel %vm56_vm1, %v82_v13, 0.0 }
  0xb3   :  { %v366_v17 = vld [vmem:[#allocation2 + $0x30] sm:$0xff]  ;;  %v48_v18 = vpop.trf.xlu0  ;;  %v87_v24 = vadd.f32 %v86_v19, %v85_v21 }
  0xb4   :  { %v83_v20 = vmul.f32 %v366_v17, %v364_v16  ;;  %65 = vst.msk [vmem:[#allocation2 + $0x40] sm:$0xff] %vm56_vm1, %v48_v18 }
  0xb6   :  { %v88_v22 = vsel %vm56_vm1, %v83_v20, 0.0 }
  0xb7   :  { %v376_v25 = vld [vmem:[#allocation2 + $0x38] sm:$0xff]  ;;  %v49_v26 = vpop.trf.xlu0  ;;  %v89_v28 = vadd.f32 %v88_v22, %v87_v24 }
  0xb8   :  { %v84_v27 = vmul.f32 %v376_v25, %v374_v23  ;;  %66 = vst.msk [vmem:[#allocation2 + $0x48] sm:$0xff] %vm56_vm1, %v49_v26 }
  0xba   :  { %v90_v29 = vsel %vm56_vm1, %v84_v27, 0.0 }
  0xbb   :  { %v91_v30 = vadd.f32 %v90_v29, %v89_v28  ;;  %v50_v31 = vpop.trf.xlu0  ;;  %v100_v34 = vld [vmem:[#allocation2 + $0x40] sm:$0xff] }
  0xbc   :  { %67 = vst.msk [vmem:[#allocation2 + $0x50] sm:$0xff] %vm56_vm1, %v50_v31  ;;  %v104_v40 = vmul.f32 %v100_v34, %v360_v14  ;;  %v152_v41 = vmul.f32 %v100_v34, %v353_v10 }
  0xbd   :  { %v92_v32 = vrot.slane %v91_v30, 4 }
  0xbe   :  { %v108_v50 = vsel %vm56_vm1, %v104_v40, 0.0  ;;  %v156_v51 = vsel %vm56_vm1, %v152_v41, 0.0 }
  0xbf   :  { %v93_v33 = vadd.f32 %v92_v32, %v91_v30  ;;  %v101_v35 = vld [vmem:[#allocation2 + $0x48] sm:$0xff]  ;;  %v51_v36 = vpop.trf.xlu0 }
  0xc0   :  { %v105_v37 = vmul.f32 %v101_v35, %v351_v9  ;;  %v153_v38 = vmul.f32 %v101_v35, %v355_v11  ;;  %68 = vst.msk [vmem:[#allocation2 + $0x58] sm:$0xff] %vm56_vm1, %v51_v36 }
  0xc1   :  { %v94_v39 = vrot.slane %v93_v33, 2 }
  0xc2   :  { %v109_v45 = vsel %vm56_vm1, %v105_v37, 0.0  ;;  %v157_v46 = vsel %vm56_vm1, %v153_v38, 0.0 }
  0xc3   :  { %v102_v42 = vld [vmem:[#allocation2 + $0x50] sm:$0xff]  ;;  %v52_v43 = vpop.trf.xlu0  ;;  %v95_v44 = vadd.f32 %v94_v39, %v93_v33  ;;  %v110_v54 = vadd.f32 %v109_v45, %v108_v50  ;;  %v158_v55 = vadd.f32 %v157_v46, %v156_v51 }
  0xc4   :  { %v106_v47 = vmul.f32 %v102_v42, %v364_v16  ;;  %v154_v48 = vmul.f32 %v102_v42, %v366_v17  ;;  %69 = vst.msk [vmem:[#allocation2 + $0x60] sm:$0xff] %vm56_vm1, %v52_v43 }
  0xc5   :  { %v96_v49 = vrot.slane %v95_v44, 1 }
  0xc6   :  { %v111_v52 = vsel %vm56_vm1, %v106_v47, 0.0  ;;  %v159_v53 = vsel %vm56_vm1, %v154_v48, 0.0 }
  0xc7   :  { %v103_v56 = vld [vmem:[#allocation2 + $0x58] sm:$0xff]  ;;  %v53_v57 = vpop.trf.xlu0  ;;  %v97_v58 = vadd.f32 %v96_v49, %v95_v44  ;;  %v112_v61 = vadd.f32 %v111_v52, %v110_v54  ;;  %v160_v62 = vadd.f32 %v159_v53, %v158_v55 }
  0xc8   :  { %v107_v59 = vmul.f32 %v103_v56, %v374_v23  ;;  %v155_v60 = vmul.f32 %v103_v56, %v376_v25  ;;  %70 = vst.msk [vmem:[#allocation2 + $0x68] sm:$0xff] %vm56_vm1, %v53_v57 }
  0xc9   :  { %99 = vst.msk [vmem:[#allocation3] sm:$0x1] %vm98_vm2, %v97_v58 }
  0xca   :  { %v113_v63 = vsel %vm56_vm1, %v107_v59, 0.0  ;;  %v161_v0 = vsel %vm56_vm1, %v155_v60, 0.0 }
  0xcb   :  { %v114_v1 = vadd.f32 %v113_v63, %v112_v61  ;;  %v162_v2 = vadd.f32 %v161_v0, %v160_v62  ;;  %v54_v3 = vpop.trf.xlu0  ;;  %v122_v6 = vld [vmem:[#allocation2 + $0x60] sm:$0xff] }
  0xcc   :  { %71 = vst.msk [vmem:[#allocation2 + $0x70] sm:$0xff] %vm56_vm1, %v54_v3  ;;  %v126_v15 = vmul.f32 %v122_v6, %v360_v14  ;;  %v174_v21 = vmul.f32 %v122_v6, %v353_v10  ;;  %v200_v22 = vmul.f32 %v122_v6, %v100_v34 }
  0xcd   :  { %v115_v4 = vrot.slane %v114_v1, 4  ;;  %v163_v5 = vrot.slane %v162_v2, 4 }
  0xce   :  { %v130_v33 = vsel %vm56_vm1, %v126_v15, 0.0  ;;  %v178_v10 = vsel %vm56_vm1, %v174_v21, 0.0  ;;  %v204_v34 = vsel %vm56_vm1, %v200_v22, 0.0 }
  0xcf   :  { %v116_v7 = vadd.f32 %v115_v4, %v114_v1  ;;  %v164_v8 = vadd.f32 %v163_v5, %v162_v2  ;;  %v123_v12 = vld [vmem:[#allocation2 + $0x68] sm:$0xff]  ;;  %v55_v13 = vpop.trf.xlu0 }
  0xd0   :  { %v127_v18 = vmul.f32 %v123_v12, %v351_v9  ;;  %v175_v19 = vmul.f32 %v123_v12, %v355_v11  ;;  %v201_v20 = vmul.f32 %v123_v12, %v101_v35  ;;  %72 = vst.msk [vmem:[#allocation2 + $0x78] sm:$0xff] %vm56_vm1, %v55_v13 }
  0xd1   :  { %v117_v24 = vrot.slane %v116_v7, 2  ;;  %v165_v26 = vrot.slane %v164_v8, 2 }
  0xd2   :  { %v131_v27 = vsel %vm56_vm1, %v127_v18, 0.0  ;;  %v179_v28 = vsel %vm56_vm1, %v175_v19, 0.0  ;;  %v205_v29 = vsel %vm56_vm1, %v201_v20, 0.0 }
  0xd3   :  { %v124_v30 = vld [vmem:[#allocation2 + $0x70] sm:$0xff]  ;;  %v118_v14 = vadd.f32 %v117_v24, %v116_v7  ;;  %v166_v32 = vadd.f32 %v165_v26, %v164_v8  ;;  %v132_v40 = vadd.f32 %v131_v27, %v130_v33  ;;  %v206_v41 = vadd.f32 %v205_v29, %v204_v34 }
  0xd4   :  { %v128_v9 = vmul.f32 %v124_v30, %v364_v16  ;;  %v176_v11 = vmul.f32 %v124_v30, %v366_v17  ;;  %v202_v31 = vmul.f32 %v124_v30, %v102_v42  ;;  %v180_v16 = vadd.f32 %v179_v28, %v178_v10 }
  0xd5   :  { %v119_v35 = vrot.slane %v118_v14, 1  ;;  %v167_v39 = vrot.slane %v166_v32, 1 }
  0xd6   :  { %v133_v36 = vsel %vm56_vm1, %v128_v9, 0.0  ;;  %v181_v37 = vsel %vm56_vm1, %v176_v11, 0.0  ;;  %v207_v38 = vsel %vm56_vm1, %v202_v31, 0.0 }
  0xd7   :  { %v125_v17 = vld [vmem:[#allocation2 + $0x78] sm:$0xff]  ;;  %v120_v42 = vadd.f32 %v119_v35, %v118_v14  ;;  %v168_v46 = vadd.f32 %v167_v39, %v166_v32  ;;  %v134_v47 = vadd.f32 %v133_v36, %v132_v40  ;;  %v182_v48 = vadd.f32 %v181_v37, %v180_v16 }
  0xd8   :  { %v129_v43 = vmul.f32 %v125_v17, %v374_v23  ;;  %v177_v44 = vmul.f32 %v125_v17, %v376_v25  ;;  %v203_v45 = vmul.f32 %v125_v17, %v103_v56  ;;  %v208_v49 = vadd.f32 %v207_v38, %v206_v41 }
  0xd9   :  { %121 = vst.msk [vmem:[#allocation3 + $0x1] sm:$0x1] %vm98_vm2, %v120_v42  ;;  %169 = vst.msk [vmem:[#allocation3 + $0x3] sm:$0x1] %vm98_vm2, %v168_v46 }
  0xda   :  { %v135_v50 = vsel %vm56_vm1, %v129_v43, 0.0  ;;  %v183_v51 = vsel %vm56_vm1, %v177_v44, 0.0  ;;  %v209_v52 = vsel %vm56_vm1, %v203_v45, 0.0 }
  0xdb   :  { %v136_v53 = vadd.f32 %v135_v50, %v134_v47  ;;  %v184_v54 = vadd.f32 %v183_v51, %v182_v48  ;;  %v210_v23 = vadd.f32 %v209_v52, %v208_v49 }
  0xdd   :  { %v137_v55 = vrot.slane %v136_v53, 4  ;;  %v185_v25 = vrot.slane %v184_v54, 4  ;;  %v211_v56 = vrot.slane %v210_v23, 4 }
  0xdf   :  { %v138_v57 = vadd.f32 %v137_v55, %v136_v53  ;;  %v186_v58 = vadd.f32 %v185_v25, %v184_v54  ;;  %v212_v59 = vadd.f32 %v211_v56, %v210_v23 }
  0xe1   :  { %v139_v60 = vrot.slane %v138_v57, 2  ;;  %v187_v61 = vrot.slane %v186_v58, 2  ;;  %v213_v62 = vrot.slane %v212_v59, 2 }
  0xe3   :  { %v140_v63 = vadd.f32 %v139_v60, %v138_v57  ;;  %v188_v0 = vadd.f32 %v187_v61, %v186_v58  ;;  %v214_v1 = vadd.f32 %v213_v62, %v212_v59 }
  0xe5   :  { %v141_v2 = vrot.slane %v140_v63, 1  ;;  %v189_v3 = vrot.slane %v188_v0, 1  ;;  %v215_v4 = vrot.slane %v214_v1, 1 }
  0xe7   :  { %v142_v5 = vadd.f32 %v141_v2, %v140_v63  ;;  %v190_v6 = vadd.f32 %v189_v3, %v188_v0  ;;  %v216_v7 = vadd.f32 %v215_v4, %v214_v1 }
  0xe9   :  { %143 = vst.msk [vmem:[#allocation3 + $0x2] sm:$0x1] %vm98_vm2, %v142_v5  ;;  %191 = vst.msk [vmem:[#allocation3 + $0x4] sm:$0x1] %vm98_vm2, %v190_v6 }
  0xea   :  { %217 = vst.msk [vmem:[#allocation3 + $0x5] sm:$0x1] %vm98_vm2, %v216_v7 }
  0xf1   :  { %v218_v8 = vld [vmem:[#allocation3] sm:$0xff] }
  0xf2   :  { %219 = vxpose.xlu0.b32.start.end [1/1] (short) (narrow) %v218_v8, 8 }
 0x172   :  { %v235_v12 = vpop.trf.xlu0 }
 0x173   :  { %252 = vst.msk [vmem:[#allocation7] sm:$0xff] %vm251_vm3, %v235_v12 }
 0x174   :  { %304 = shalt.err (!%p301_p12)
}
 0x175   :  { %s305_s22 = scalar_lea.hbm %s443_s1, 128 }
 0x176   :  { %p306_p13 = scmp.ne.s32.totalorder %s443_s1, %s305_s22  ;;  %p309_p0 = scmp.lt.u32.totalorder %s305_s22, %s443_s1 }
 0x178   :  { %p311_p1 = pnand %p309_p0, %p306_p13 }
 0x17a   :  { %314 = shalt.err (!%p311_p1)
}
 0x17b   :  { %262 = dma.vmem_to_hbm [thread:$0]  %s260_s18, 128, %s443_s1, [#allocation6]  }
 0x17c   :  { %317 = dma.done.wait [#allocation6], 128  }
 0x17d   :  { %318 = vsyncadd [#allocation6], 4294967168 }
 0x17e   :  { %266 = vsyncpa [#allocation5], 1 }
 0x17f   :  { %267 = vsyncpa [#allocation6], 1 }

</bundles_post_ra>
